<compile_context>
chip_gen: v7x
topology: tpu7x:2x2x1
jax: 0.10.0
libtpu: 0.0.40
codegen_flags: <defaults>
</compile_context>

<pallas_src>
import jax
import jax.numpy as jnp
from jax.experimental import pallas as pl
from jax.experimental.pallas import tpu as pltpu

EPS = 1e-5

_FUSED_LIMIT_BYTES = 4 * 1024 * 1024    # fused single-pass path threshold (f32 copy of x)
_TARGET_TILE_BYTES = 4 * 1024 * 1024    # per-buffer x tile target for the streaming path
_MAX_TILE_ROWS = 8192
_VMEM_LIMIT = 48 * 1024 * 1024          # > default scoped VMEM on v5e/v6e/v7x, < v7x physical


def _round_up(a: int, b: int) -> int:
    return (a + b - 1) // b * b


# ---------------------------------------------------------------------------
# Fused single-pass kernel (whole array in one VMEM block): stats + normalize.
# ---------------------------------------------------------------------------
def _make_fused_kernel(n_rows: int, eps: float):
    inv_n = 1.0 / float(n_rows)

    def kernel(x_ref, gamma_ref, beta_ref, o_ref):
        x = x_ref[...].astype(jnp.float32)
        s = jnp.sum(x, axis=0, keepdims=True)            # (1, C)
        sq = jnp.sum(x * x, axis=0, keepdims=True)       # (1, C)
        mean = s * inv_n
        var = sq * inv_n - mean * mean                   # biased variance
        invstd = jax.lax.rsqrt(var + eps)
        scale = gamma_ref[...] * invstd
        bias = beta_ref[...] - mean * scale
        o_ref[...] = (x * scale + bias).astype(o_ref.dtype)

    return kernel


# ---------------------------------------------------------------------------
# Pass 1 (streaming): per-tile partial sum / sum-of-squares.
# Each grid step writes its own (8, Cp) partial block -> grid axis is
# "parallel" (no resident accumulator), remainder tile is masked in-kernel.
# ---------------------------------------------------------------------------
def _make_stats_kernel(tile_r: int, valid_rows: int, needs_mask: bool):
    def kernel(x_ref, psum_ref, psq_ref):
        x = x_ref[...].astype(jnp.float32)
        if needs_mask:
            row = jax.lax.broadcasted_iota(jnp.int32, x.shape, 0)
            row = row + pl.program_id(0) * tile_r
            x = jnp.where(row < valid_rows, x, 0.0)
        s = jnp.sum(x, axis=0, keepdims=True)             # (1, Cp)
        sq = jnp.sum(x * x, axis=0, keepdims=True)        # (1, Cp)
        psum_ref[...] = jnp.broadcast_to(s, psum_ref.shape)
        psq_ref[...] = jnp.broadcast_to(sq, psq_ref.shape)

    return kernel


# ---------------------------------------------------------------------------
# Pass 2 (streaming): y = x * scale + bias   (affine folded into scale/bias)
# ---------------------------------------------------------------------------
def _norm_kernel(x_ref, scale_ref, bias_ref, o_ref):
    x = x_ref[...].astype(jnp.float32)
    o_ref[...] = (x * scale_ref[...] + bias_ref[...]).astype(o_ref.dtype)


def point_batch_norm(x, gamma, beta, eps: float = EPS):
    """Forward pass of PointBatchNorm (training-mode batch statistics)."""
    orig_shape = x.shape
    if x.ndim == 3:
        x2 = x.reshape(-1, x.shape[-1])
    elif x.ndim == 2:
        x2 = x
    else:
        raise NotImplementedError

    rows, C = x2.shape
    gamma_f = gamma.reshape(C).astype(jnp.float32)
    beta_f = beta.reshape(C).astype(jnp.float32)

    # ---------------- small inputs: fused single pass -----------------------
    if rows * C * 4 <= _FUSED_LIMIT_BYTES:
        out = pl.pallas_call(
            _make_fused_kernel(rows, eps),
            out_shape=jax.ShapeDtypeStruct((rows, C), x.dtype),
            grid_spec=pltpu.PrefetchScalarGridSpec(
                num_scalar_prefetch=0,
                grid=(1,),
                in_specs=[
                    pl.BlockSpec((rows, C), lambda i: (0, 0)),
                    pl.BlockSpec((1, C), lambda i: (0, 0)),
                    pl.BlockSpec((1, C), lambda i: (0, 0)),
                ],
                out_specs=pl.BlockSpec((rows, C), lambda i: (0, 0)),
            ),
            compiler_params=pltpu.CompilerParams(
                dimension_semantics=("arbitrary",),
                vmem_limit_bytes=_VMEM_LIMIT,
            ),
        )(x2, gamma_f.reshape(1, C), beta_f.reshape(1, C))
        return out.reshape(orig_shape)

    # ---------------- large inputs: streaming two-pass path -----------------
    # Lane-dense packing: fold k rows into one packed row of width k*C == 128
    # (pure view — contiguous reshape, no data movement).
    if C % 128 == 0:
        k = 1
    elif 128 % C == 0 and rows % (128 // C) == 0:
        k = 128 // C
    else:
        k = 1
    Cp = k * C
    Rp = rows // k
    xp = x2.reshape(Rp, Cp)

    itemsize = jnp.dtype(x.dtype).itemsize
    tile_r = max(8, (_TARGET_TILE_BYTES // (Cp * itemsize)) // 8 * 8)
    tile_r = min(tile_r, _MAX_TILE_ROWS)
    tile_r = min(tile_r, _round_up(Rp, 8))
    grid_n = int(pl.cdiv(Rp, tile_r))
    needs_mask = (Rp % tile_r) != 0

    # --- pass 1: per-tile partial sums / sum-of-squares ---------------------
    psum, psq = pl.pallas_call(
        _make_stats_kernel(tile_r, Rp, needs_mask),
        out_shape=(
            jax.ShapeDtypeStruct((grid_n * 8, Cp), jnp.float32),
            jax.ShapeDtypeStruct((grid_n * 8, Cp), jnp.float32),
        ),
        grid_spec=pltpu.PrefetchScalarGridSpec(
            num_scalar_prefetch=0,
            grid=(grid_n,),
            in_specs=[pl.BlockSpec((tile_r, Cp), lambda i: (i, 0))],
            out_specs=(
                pl.BlockSpec((8, Cp), lambda i: (i, 0)),
                pl.BlockSpec((8, Cp), lambda i: (i, 0)),
            ),
        ),
        compiler_params=pltpu.CompilerParams(
            dimension_semantics=("parallel",),
            vmem_limit_bytes=_VMEM_LIMIT,
        ),
    )(xp)

    # --- glue: tiny per-channel math (plain XLA) ----------------------------
    s_rep = psum.reshape(grid_n, 8, Cp)[:, 0, :].sum(axis=0)       # (Cp,)
    sq_rep = psq.reshape(grid_n, 8, Cp)[:, 0, :].sum(axis=0)       # (Cp,)
    s = s_rep.reshape(k, C).sum(axis=0)                            # (C,)
    sq = sq_rep.reshape(k, C).sum(axis=0)                          # (C,)
    n = jnp.float32(rows)
    mean = s / n
    var = sq / n - mean * mean                                     # biased
    invstd = jax.lax.rsqrt(var + eps)
    scale = gamma_f * invstd
    bias = beta_f - mean * scale
    scale_p = jnp.tile(scale, (k,)).reshape(1, Cp)
    bias_p = jnp.tile(bias, (k,)).reshape(1, Cp)

    # --- pass 2: y = x*scale + bias, lane-dense large tiles -----------------
    out = pl.pallas_call(
        _norm_kernel,
        out_shape=jax.ShapeDtypeStruct((Rp, Cp), x.dtype),
        grid_spec=pltpu.PrefetchScalarGridSpec(
            num_scalar_prefetch=0,
            grid=(grid_n,),
            in_specs=[
                pl.BlockSpec((tile_r, Cp), lambda i: (i, 0)),
                pl.BlockSpec((1, Cp), lambda i: (0, 0)),
                pl.BlockSpec((1, Cp), lambda i: (0, 0)),
            ],
            out_specs=pl.BlockSpec((tile_r, Cp), lambda i: (i, 0)),
        ),
        compiler_params=pltpu.CompilerParams(
            dimension_semantics=("parallel",),
            vmem_limit_bytes=_VMEM_LIMIT,
        ),
    )(xp, scale_p, bias_p)

    return out.reshape(orig_shape)


def _reference(x, gamma, beta, eps=EPS):
    """Pure-JAX reference for training-mode BatchNorm1d, channels-last."""
    x2 = x.reshape(-1, x.shape[-1]).astype(jnp.float32)
    mean = x2.mean(axis=0, keepdims=True)
    var = x2.var(axis=0, keepdims=True)  # biased
    y = (x2 - mean) / jnp.sqrt(var + eps) * gamma.reshape(1, -1) + beta.reshape(1, -1)
    return y.reshape(x.shape).astype(x.dtype)


if __name__ == "__main__":
    key = jax.random.PRNGKey(0)
    k1, k2, k3, k4 = jax.random.split(key, 4)

    # ---- small demo shapes (fused single-pass path) ------------------------
    C = 32
    gamma = jnp.ones((C,), jnp.float32)    # nn.BatchNorm1d default weight
    beta = jnp.zeros((C,), jnp.float32)    # nn.BatchNorm1d default bias

    x2d = jax.random.normal(k1, (256, C), jnp.float32)        # [B*N, C]
    x3d = jax.random.normal(k2, (32, 8, C), jnp.float32)      # [B*N, L, C]

    y2d = jax.block_until_ready(point_batch_norm(x2d, gamma, beta))
    y3d = jax.block_until_ready(point_batch_norm(x3d, gamma, beta))

    assert y2d.shape == x2d.shape and y3d.shape == x3d.shape
    assert jnp.max(jnp.abs(y2d - _reference(x2d, gamma, beta))) < 1e-4
    assert jnp.max(jnp.abs(y3d - _reference(x3d, gamma, beta))) < 1e-4

    # ---- larger inputs exercise the streaming two-pass path ----------------
    # (lane-packed + masked remainder tile)
    C2 = 64
    g2 = 1.0 + 0.1 * jax.random.normal(k3, (C2,), jnp.float32)
    b2 = 0.1 * jax.random.normal(k4, (C2,), jnp.float32)
    xl = 2.0 * jax.random.normal(k1, (48_000, C2), jnp.float32) + 0.5
    yl = jax.block_until_ready(point_batch_norm(xl, g2, b2))
    assert jnp.max(jnp.abs(yl - _reference(xl, g2, b2))) < 5e-4

    # (unpacked fallback: rows not divisible by 128//C, masked remainder)
    xo = jax.random.normal(k2, (33_333, C), jnp.float32)
    yo = jax.block_until_ready(point_batch_norm(xo, gamma, beta))
    assert jnp.max(jnp.abs(yo - _reference(xo, gamma, beta))) < 5e-4

    print("KERNEL_OK")
</pallas_src>

<mosaic_0001>
module attributes {stable_mosaic.version = 11 : i64} {
  func.func @kernel(%arg0: i32, %arg1: memref<256x32xf32, #tpu.memory_space<vmem>>, %arg2: memref<1x32xf32, #tpu.memory_space<vmem>>, %arg3: memref<1x32xf32, #tpu.memory_space<vmem>>, %arg4: memref<256x32xf32, #tpu.memory_space<vmem>>) attributes {dimension_semantics = [#tpu.dimension_semantics<arbitrary>], iteration_bounds = array<i64: 1>, scalar_prefetch = 0 : i64, scratch_operands = 0 : i64, tpu.core_type = #tpu.core_type<tc>, window_params = [{pipeline_mode = #tpu.pipeline_mode<synchronous>, transform_indices = @transform_0, window_bounds = array<i64: 256, 32>}, {pipeline_mode = #tpu.pipeline_mode<synchronous>, transform_indices = @transform_1, window_bounds = array<i64: 1, 32>}, {pipeline_mode = #tpu.pipeline_mode<synchronous>, transform_indices = @transform_2, window_bounds = array<i64: 1, 32>}, {pipeline_mode = #tpu.pipeline_mode<synchronous>, transform_indices = @transform_3, window_bounds = array<i64: 256, 32>}]} {
    %c0 = arith.constant 0 : index
    %c0_0 = arith.constant 0 : index
    %0 = vector.load %arg1[%c0, %c0_0] : memref<256x32xf32, #tpu.memory_space<vmem>>, vector<256x32xf32>
    %cst = arith.constant dense<0.000000e+00> : vector<32xf32>
    %1 = vector.multi_reduction <add>, %0, %cst [0] : vector<256x32xf32> to vector<32xf32>
    %2 = vector.shape_cast %1 : vector<32xf32> to vector<1x32xf32>
    %3 = arith.mulf %0, %0 : vector<256x32xf32>
    %cst_1 = arith.constant dense<0.000000e+00> : vector<32xf32>
    %4 = vector.multi_reduction <add>, %3, %cst_1 [0] : vector<256x32xf32> to vector<32xf32>
    %5 = vector.shape_cast %4 : vector<32xf32> to vector<1x32xf32>
    %cst_2 = arith.constant 3.906250e-03 : f32
    %6 = vector.broadcast %cst_2 : f32 to vector<1x32xf32>
    %7 = arith.mulf %2, %6 : vector<1x32xf32>
    %cst_3 = arith.constant 3.906250e-03 : f32
    %8 = vector.broadcast %cst_3 : f32 to vector<1x32xf32>
    %9 = arith.mulf %5, %8 : vector<1x32xf32>
    %10 = arith.mulf %7, %7 : vector<1x32xf32>
    %11 = arith.subf %9, %10 : vector<1x32xf32>
    %cst_4 = arith.constant 9.99999974E-6 : f32
    %12 = vector.broadcast %cst_4 : f32 to vector<1x32xf32>
    %13 = arith.addf %11, %12 : vector<1x32xf32>
    %14 = math.rsqrt %13 : vector<1x32xf32>
    %c0_5 = arith.constant 0 : index
    %c0_6 = arith.constant 0 : index
    %15 = vector.load %arg2[%c0_5, %c0_6] : memref<1x32xf32, #tpu.memory_space<vmem>>, vector<1x32xf32>
    %16 = arith.mulf %15, %14 : vector<1x32xf32>
    %c0_7 = arith.constant 0 : index
    %c0_8 = arith.constant 0 : index
    %17 = vector.load %arg3[%c0_7, %c0_8] : memref<1x32xf32, #tpu.memory_space<vmem>>, vector<1x32xf32>
    %18 = arith.mulf %7, %16 : vector<1x32xf32>
    %19 = arith.subf %17, %18 : vector<1x32xf32>
    %20 = vector.broadcast %16 : vector<1x32xf32> to vector<256x32xf32>
    %21 = arith.mulf %0, %20 : vector<256x32xf32>
    %22 = vector.broadcast %19 : vector<1x32xf32> to vector<256x32xf32>
    %23 = arith.addf %21, %22 : vector<256x32xf32>
    %c0_9 = arith.constant 0 : index
    %c0_10 = arith.constant 0 : index
    %24 = vector.load %arg4[%c0_9, %c0_10] : memref<256x32xf32, #tpu.memory_space<vmem>>, vector<256x32xf32>
    tpu.vector_store %arg4[%c0_9, %c0_10], %23 {strides = array<i32>} : memref<256x32xf32, #tpu.memory_space<vmem>>, vector<256x32xf32>,
    return
  }
  func.func @transform_0(%arg0: i32) -> (i32, i32) {
    %c0_i32 = arith.constant 0 : i32
    %c0_i32_0 = arith.constant 0 : i32
    %c0_i32_1 = arith.constant 0 : i32
    return %c0_i32, %c0_i32_0 : i32, i32
  }
  func.func @transform_1(%arg0: i32) -> (i32, i32) {
    %c0_i32 = arith.constant 0 : i32
    %c0_i32_0 = arith.constant 0 : i32
    %c0_i32_1 = arith.constant 0 : i32
    return %c0_i32, %c0_i32_0 : i32, i32
  }
  func.func @transform_2(%arg0: i32) -> (i32, i32) {
    %c0_i32 = arith.constant 0 : i32
    %c0_i32_0 = arith.constant 0 : i32
    %c0_i32_1 = arith.constant 0 : i32
    return %c0_i32, %c0_i32_0 : i32, i32
  }
  func.func @transform_3(%arg0: i32) -> (i32, i32) {
    %c0_i32 = arith.constant 0 : i32
    %c0_i32_0 = arith.constant 0 : i32
    %c0_i32_1 = arith.constant 0 : i32
    return %c0_i32, %c0_i32_0 : i32, i32
  }
}

</mosaic_0001>

<bundles_post_ra>
// kernel: tpu_custom_call.1
= control target key start
LH: loop header
LB: loop body
LE: loop exit
PB: predicated region body
PF: predicated region fallthrough
CT: control target
= control target key end

     0   :  { %vm46_vm0 = vcmask 261120   ;;  %s916_s0 = inlined_call_operand.vmem [shape: f32[256,32], index: 0, kind: input, shape index: {}]   ;;  %s917_s1 = inlined_call_operand.vmem [shape: f32[1,32], index: 1, kind: input, shape index: {}]   ;;  %s918_s2 = inlined_call_operand.vmem [shape: f32[1,32], index: 2, kind: input, shape index: {}]   ;;  %s919_s3 = inlined_call_operand.vmem [shape: f32[256,32], index: 3, kind: output, shape index: {}]  }
   0x1   :  { %v365_v0 = vld [vmem:[%s916_s0] sm:$0xff]  ;;  %v370_v1 = vld [vmem:[%s916_s0 + $0x8] sm:$0xff]  ;;  %v375_v2 = vld [vmem:[%s916_s0 + $0x10] sm:$0xff] }
   0x2   :  { %v380_v3 = vld [vmem:[%s916_s0 + $0x18] sm:$0xff]  ;;  %v47_v4 = vsel %vm46_vm0, %v365_v0, 0.0  ;;  %v48_v5 = vsel %vm46_vm0, %v370_v1, 0.0  ;;  %v50_v6 = vsel %vm46_vm0, %v375_v2, 0.0  ;;  %v391_v7 = vld [vmem:[%s916_s0 + $0x20] sm:$0xff]  ;;  %v398_v10 = vld [vmem:[%s916_s0 + $0x28] sm:$0xff]  ;;  %v116_v29 = vmul.f32 %v365_v0, %v365_v0 }
   0x3   :  { %v49_v8 = vadd.f32 %v48_v5, %v47_v4  ;;  %v52_v9 = vsel %vm46_vm0, %v380_v3, 0.0  ;;  %v54_v12 = vsel %vm46_vm0, %v391_v7, 0.0  ;;  %v405_v13 = vld [vmem:[%s916_s0 + $0x30] sm:$0xff]  ;;  %v56_v15 = vsel %vm46_vm0, %v398_v10, 0.0  ;;  %v412_v16 = vld [vmem:[%s916_s0 + $0x38] sm:$0xff]  ;;  %v419_v19 = vld [vmem:[%s916_s0 + $0x40] sm:$0xff] }
   0x4   :  { %v58_v18 = vsel %vm46_vm0, %v405_v13, 0.0  ;;  %v60_v21 = vsel %vm46_vm0, %v412_v16, 0.0  ;;  %v426_v22 = vld [vmem:[%s916_s0 + $0x48] sm:$0xff]  ;;  %v62_v24 = vsel %vm46_vm0, %v419_v19, 0.0  ;;  %v433_v25 = vld [vmem:[%s916_s0 + $0x50] sm:$0xff]  ;;  %v438_v27 = vld [vmem:[%s916_s0 + $0x58] sm:$0xff]  ;;  %v117_v30 = vmul.f32 %v370_v1, %v370_v1 }
   0x5   :  { %v51_v11 = vadd.f32 %v50_v6, %v49_v8  ;;  %v64_v28 = vsel %vm46_vm0, %v426_v22, 0.0  ;;  %v118_v31 = vmul.f32 %v375_v2, %v375_v2  ;;  %v66_v33 = vsel %vm46_vm0, %v433_v25, 0.0  ;;  %v455_v35 = vld [vmem:[%s916_s0 + $0x60] sm:$0xff]  ;;  %v467_v42 = vld [vmem:[%s916_s0 + $0x68] sm:$0xff]  ;;  %v477_v48 = vld [vmem:[%s916_s0 + $0x70] sm:$0xff] }
   0x6   :  { %v119_v34 = vmul.f32 %v380_v3, %v380_v3  ;;  %v68_v37 = vsel %vm46_vm0, %v438_v27, 0.0  ;;  %v120_v38 = vmul.f32 %v391_v7, %v391_v7  ;;  %v148_v39 = vsel %vm46_vm0, %v116_v29, 0.0  ;;  %v487_v54 = vld [vmem:[%s916_s0 + $0x78] sm:$0xff]  ;;  %v497_v60 = vld [vmem:[%s916_s0 + $0x80] sm:$0xff]  ;;  %v507_v6 = vld [vmem:[%s916_s0 + $0x88] sm:$0xff] }
   0x7   :  { %v53_v14 = vadd.f32 %v52_v9, %v51_v11  ;;  %v149_v40 = vsel %vm46_vm0, %v117_v30, 0.0  ;;  %v151_v41 = vsel %vm46_vm0, %v118_v31, 0.0  ;;  %v70_v45 = vsel %vm46_vm0, %v455_v35, 0.0 }
   0x8   :  { %v150_v44 = vadd.f32 %v149_v40, %v148_v39  ;;  %v121_v46 = vmul.f32 %v398_v10, %v398_v10  ;;  %v153_v47 = vsel %vm46_vm0, %v119_v34, 0.0  ;;  %v72_v51 = vsel %vm46_vm0, %v467_v42, 0.0  ;;  %v547_v39 = vld [vmem:[%s916_s0 + $0xa8] sm:$0xff] }
   0x9   :  { %v55_v17 = vadd.f32 %v54_v12, %v53_v14  ;;  %v122_v52 = vmul.f32 %v405_v13, %v405_v13  ;;  %v155_v53 = vsel %vm46_vm0, %v120_v38, 0.0  ;;  %v74_v57 = vsel %vm46_vm0, %v477_v48, 0.0 }
   0xa   :  { %v152_v50 = vadd.f32 %v151_v41, %v150_v44  ;;  %v123_v58 = vmul.f32 %v412_v16, %v412_v16  ;;  %v157_v59 = vsel %vm46_vm0, %v121_v46, 0.0  ;;  %v76_v63 = vsel %vm46_vm0, %v487_v54, 0.0  ;;  %v557_v46 = vld [vmem:[%s916_s0 + $0xb0] sm:$0xff] }
   0xb   :  { %v57_v20 = vadd.f32 %v56_v15, %v55_v17  ;;  %v124_v4 = vmul.f32 %v419_v19, %v419_v19  ;;  %v159_v5 = vsel %vm46_vm0, %v122_v52, 0.0  ;;  %v78_v11 = vsel %vm46_vm0, %v497_v60, 0.0  ;;  %v517_v15 = vld [vmem:[%s916_s0 + $0x90] sm:$0xff] }
   0xc   :  { %v154_v56 = vadd.f32 %v153_v47, %v152_v50  ;;  %v125_v12 = vmul.f32 %v426_v22, %v426_v22  ;;  %v161_v14 = vsel %vm46_vm0, %v123_v58, 0.0  ;;  %v82_v29 = vsel %vm46_vm0, %v517_v15, 0.0 }
   0xd   :  { %v59_v23 = vadd.f32 %v58_v18, %v57_v20  ;;  %v80_v20 = vsel %vm46_vm0, %v507_v6, 0.0  ;;  %v127_v30 = vmul.f32 %v438_v27, %v438_v27  ;;  %v129_v44 = vmul.f32 %v467_v42, %v467_v42 }
   0xe   :  { %v156_v62 = vadd.f32 %v155_v53, %v154_v56  ;;  %v165_v31 = vsel %vm46_vm0, %v125_v12, 0.0  ;;  %v88_v50 = vsel %vm46_vm0, %v547_v39, 0.0  ;;  %v567_v53 = vld [vmem:[%s916_s0 + $0xb8] sm:$0xff]  ;;  %v131_v58 = vmul.f32 %v487_v54, %v487_v54 }
   0xf   :  { %v61_v26 = vadd.f32 %v60_v21, %v59_v23  ;;  %v126_v21 = vmul.f32 %v433_v25, %v433_v25  ;;  %v163_v23 = vsel %vm46_vm0, %v124_v4, 0.0  ;;  %v92_v4 = vsel %vm46_vm0, %v567_v53, 0.0 }
  0x10   :  { %v158_v9 = vadd.f32 %v157_v59, %v156_v62  ;;  %v173_v59 = vsel %vm46_vm0, %v129_v44, 0.0 }
  0x11   :  { %v63_v32 = vadd.f32 %v62_v24, %v61_v26  ;;  %v527_v24 = vld [vmem:[%s916_s0 + $0x98] sm:$0xff]  ;;  %v167_v38 = vsel %vm46_vm0, %v126_v21, 0.0 }
  0x12   :  { %v160_v18 = vadd.f32 %v159_v5, %v158_v9  ;;  %v132_v5 = vmul.f32 %v497_v60, %v497_v60  ;;  %v587_v9 = vld [vmem:[%s916_s0 + $0xc8] sm:$0xff] }
  0x13   :  { %v65_v36 = vadd.f32 %v64_v28, %v63_v32  ;;  %v537_v32 = vld [vmem:[%s916_s0 + $0xa0] sm:$0xff] }
  0x14   :  { %v162_v28 = vadd.f32 %v161_v14, %v160_v18  ;;  %v177_v18 = vsel %vm46_vm0, %v131_v58, 0.0  ;;  %v136_v44 = vmul.f32 %v537_v32, %v537_v32 }
  0x15   :  { %v67_v43 = vadd.f32 %v66_v33, %v65_v36  ;;  %v84_v36 = vsel %vm46_vm0, %v527_v24, 0.0 }
  0x16   :  { %v164_v34 = vadd.f32 %v163_v23, %v162_v28  ;;  %v134_v28 = vmul.f32 %v517_v15, %v517_v15 }
  0x17   :  { %v69_v49 = vadd.f32 %v68_v37, %v67_v43  ;;  %v128_v37 = vmul.f32 %v455_v35, %v455_v35  ;;  %v86_v43 = vsel %vm46_vm0, %v537_v32, 0.0 }
  0x18   :  { %v166_v41 = vadd.f32 %v165_v31, %v164_v34 }
  0x19   :  { %v71_v55 = vadd.f32 %v70_v45, %v69_v49  ;;  %v169_v45 = vsel %vm46_vm0, %v127_v30, 0.0  ;;  %v171_v52 = vsel %vm46_vm0, %v128_v37, 0.0  ;;  %v607_v30 = vld [vmem:[%s916_s0 + $0xd8] sm:$0xff] }
  0x1a   :  { %v168_v49 = vadd.f32 %v167_v38, %v166_v41  ;;  %v617_v38 = vld [vmem:[%s916_s0 + $0xe0] sm:$0xff] }
  0x1b   :  { %v73_v61 = vadd.f32 %v72_v51, %v71_v55  ;;  %v130_v51 = vmul.f32 %v477_v48, %v477_v48 }
  0x1c   :  { %v170_v56 = vadd.f32 %v169_v45, %v168_v49  ;;  %v183_v45 = vsel %vm46_vm0, %v134_v28, 0.0 }
  0x1d   :  { %v75_v8 = vadd.f32 %v74_v57, %v73_v61  ;;  %v90_v57 = vsel %vm46_vm0, %v557_v46, 0.0  ;;  %v577_v61 = vld [vmem:[%s916_s0 + $0xc0] sm:$0xff] }
  0x1e   :  { %v94_v14 = vsel %vm46_vm0, %v577_v61, 0.0 }
  0x1f   :  { %v77_v17 = vadd.f32 %v76_v63, %v75_v8  ;;  %v172_v63 = vadd.f32 %v171_v52, %v170_v56  ;;  %v175_v8 = vsel %vm46_vm0, %v130_v51, 0.0  ;;  %v102_v51 = vsel %vm46_vm0, %v617_v38, 0.0  ;;  %v637_v56 = vld [vmem:[%s916_s0 + $0xf0] sm:$0xff] }
  0x20   :  { %v137_v52 = vmul.f32 %v547_v39, %v547_v39 }
  0x21   :  { %v79_v26 = vadd.f32 %v78_v11, %v77_v17  ;;  %v174_v12 = vadd.f32 %v173_v59, %v172_v63  ;;  %v133_v17 = vmul.f32 %v507_v6, %v507_v6  ;;  %v187_v63 = vsel %vm46_vm0, %v136_v44, 0.0 }
  0x22   :  { %v143_v44 = vmul.f32 %v607_v30, %v607_v30 }
  0x23   :  { %v81_v33 = vadd.f32 %v80_v20, %v79_v26  ;;  %v597_v20 = vld [vmem:[%s916_s0 + $0xd0] sm:$0xff]  ;;  %v176_v23 = vadd.f32 %v175_v8, %v174_v12  ;;  %v96_v26 = vsel %vm46_vm0, %v587_v9, 0.0  ;;  %v181_v37 = vsel %vm46_vm0, %v133_v17, 0.0 }
  0x24   :  { %v98_v34 = vsel %vm46_vm0, %v597_v20, 0.0  ;;  %v139_v12 = vmul.f32 %v567_v53, %v567_v53 }
  0x25   :  { %v83_v40 = vadd.f32 %v82_v29, %v81_v33  ;;  %v179_v29 = vsel %vm46_vm0, %v132_v5, 0.0  ;;  %v178_v33 = vadd.f32 %v177_v18, %v176_v23  ;;  %v140_v23 = vmul.f32 %v577_v61, %v577_v61 }
  0x27   :  { %v85_v47 = vadd.f32 %v84_v36, %v83_v40  ;;  %v135_v36 = vmul.f32 %v527_v24, %v527_v24  ;;  %v180_v41 = vadd.f32 %v179_v29, %v178_v33  ;;  %v193_v33 = vsel %vm46_vm0, %v139_v12, 0.0 }
  0x29   :  { %v87_v55 = vadd.f32 %v86_v43, %v85_v47  ;;  %v100_v43 = vsel %vm46_vm0, %v607_v30, 0.0  ;;  %v627_v47 = vld [vmem:[%s916_s0 + $0xe8] sm:$0xff] }
  0x2a   :  { %v104_v59 = vsel %vm46_vm0, %v627_v47, 0.0 }
  0x2b   :  { %v89_v62 = vadd.f32 %v88_v50, %v87_v55  ;;  %v182_v50 = vadd.f32 %v181_v37, %v180_v41  ;;  %v185_v55 = vsel %vm46_vm0, %v135_v36, 0.0  ;;  %v142_v37 = vmul.f32 %v597_v20, %v597_v20 }
  0x2d   :  { %v91_v11 = vadd.f32 %v90_v57, %v89_v62  ;;  %v184_v58 = vadd.f32 %v183_v45, %v182_v50  ;;  %v138_v62 = vmul.f32 %v557_v46, %v557_v46  ;;  %v144_v50 = vmul.f32 %v617_v38, %v617_v38 }
  0x2f   :  { %v93_v21 = vadd.f32 %v92_v4, %v91_v11  ;;  %v647_v4 = vld [vmem:[%s916_s0 + $0xf8] sm:$0xff]  ;;  %v186_v8 = vadd.f32 %v185_v55, %v184_v58  ;;  %v106_v11 = vsel %vm46_vm0, %v637_v56, 0.0  ;;  %v201_v58 = vsel %vm46_vm0, %v143_v44, 0.0 }
  0x31   :  { %v95_v31 = vadd.f32 %v94_v14, %v93_v21  ;;  %v189_v14 = vsel %vm46_vm0, %v137_v52, 0.0  ;;  %v188_v18 = vadd.f32 %v187_v63, %v186_v8  ;;  %v108_v21 = vsel %vm46_vm0, %v647_v4, 0.0 }
  0x32   :  { %v203_v63 = vsel %vm46_vm0, %v144_v50, 0.0 }
  0x33   :  { %v97_v40 = vadd.f32 %v96_v26, %v95_v31  ;;  %v191_v26 = vsel %vm46_vm0, %v138_v62, 0.0  ;;  %v190_v29 = vadd.f32 %v189_v14, %v188_v18  ;;  %v141_v31 = vmul.f32 %v587_v9, %v587_v9 }
  0x34   :  { %v146_v62 = vmul.f32 %v637_v56, %v637_v56 }
  0x35   :  { %v99_v49 = vadd.f32 %v98_v34, %v97_v40  ;;  %v192_v36 = vadd.f32 %v191_v26, %v190_v29  ;;  %v195_v40 = vsel %vm46_vm0, %v140_v23, 0.0  ;;  %v197_v45 = vsel %vm46_vm0, %v141_v31, 0.0 }
  0x37   :  { %v101_v57 = vadd.f32 %v100_v43, %v99_v49  ;;  %v194_v43 = vadd.f32 %v193_v33, %v192_v36 }
  0x39   :  { %v103_v5 = vadd.f32 %v102_v51, %v101_v57  ;;  %v196_v49 = vadd.f32 %v195_v40, %v194_v43  ;;  %v199_v51 = vsel %vm46_vm0, %v142_v37, 0.0  ;;  %v145_v57 = vmul.f32 %v627_v47, %v627_v47 }
  0x3b   :  { %v105_v17 = vadd.f32 %v104_v59, %v103_v5  ;;  %v198_v55 = vadd.f32 %v197_v45, %v196_v49  ;;  %v205_v12 = vsel %vm46_vm0, %v145_v57, 0.0 }
  0x3d   :  { %v107_v28 = vadd.f32 %v106_v11, %v105_v17  ;;  %v200_v59 = vadd.f32 %v199_v51, %v198_v55  ;;  %v147_v11 = vmul.f32 %v647_v4, %v647_v4  ;;  %v207_v17 = vsel %vm46_vm0, %v146_v62, 0.0  ;;  %v223_v55 = vld [vmem:[%s917_s1] sm:$0x1] }
  0x3e   :  { %v229_v51 = vlaneseq  ;;  %v225_v62 = vld [vmem:[%s918_s2] sm:$0x1] }
  0x3f   :  { %v109_v34 = vadd.f32 %v108_v21, %v107_v28  ;;  %v202_v8 = vadd.f32 %v201_v58, %v200_v59  ;;  %v209_v23 = vsel %vm46_vm0, %v147_v11, 0.0 }
  0x41   :  { %v110_v41 = vrot.slane %v109_v34, 4  ;;  %v204_v14 = vadd.f32 %v203_v63, %v202_v8 }
  0x43   :  { %v111_v52 = vadd.f32 %v110_v41, %v109_v34  ;;  %v206_v21 = vadd.f32 %v205_v12, %v204_v14 }
  0x45   :  { %v112_v5 = vrot.slane %v111_v52, 2  ;;  %v208_v26 = vadd.f32 %v207_v17, %v206_v21 }
  0x47   :  { %v113_v18 = vadd.f32 %v112_v5, %v111_v52  ;;  %v210_v29 = vadd.f32 %v209_v23, %v208_v26  ;;  %v230_v52 = vshrl.u32 %v229_v51, 7 }
  0x49   :  { %v114_v28 = vrot.slane %v113_v18, 1  ;;  %v211_v31 = vrot.slane %v210_v29, 4  ;;  %v231_v57 = vsub.s32 0, %v230_v52 }
  0x4b   :  { %v115_v33 = vadd.f32 %v114_v28, %v113_v18  ;;  %v212_v34 = vadd.f32 %v211_v31, %v210_v29 }
  0x4d   :  { %v213_v36 = vrot.slane %v212_v34, 2  ;;  %v217_v40 = vmul.f32 0.00390625, %v115_v33 }
  0x4f   :  { %v214_v37 = vadd.f32 %v213_v36, %v212_v34  ;;  %v219_v44 = vmul.f32 %v217_v40, %v217_v40 }
  0x51   :  { %v215_v41 = vrot.slane %v214_v37, 1 }
  0x53   :  { %v216_v43 = vadd.f32 %v215_v41, %v214_v37 }
  0x55   :  { %v218_v45 = vmul.f32 0.00390625, %v216_v43 }
  0x57   :  { %v220_v49 = vsub.f32 %v218_v45, %v219_v44 }
  0x59   :  { %v221_v50 = vadd.f32 1e-05, %v220_v49 }
  0x5b   :  { %340 = vrsqrt.f32 %v221_v50 }
  0x65   :  { %v341_v58 = vpop.eup %340 }
  0x66   :  { %v224_v59 = vmul.f32 %v341_v58, %v223_v55 }
  0x68   :  { %v226_v63 = vmul.f32 %v224_v59, %v217_v40  ;;  %v688_v5 = vrot.slane %v224_v59, %v231_v57 }
  0x6a   :  { %v227_v8 = vsub.f32 %v225_v62, %v226_v63  ;;  %v234_v11 = vmul.f32 %v688_v5, %v365_v0  ;;  %v235_v12 = vmul.f32 %v688_v5, %v370_v1  ;;  %v236_v14 = vmul.f32 %v688_v5, %v375_v2 }
  0x6b   :  { %v237_v17 = vmul.f32 %v688_v5, %v380_v3  ;;  %v238_v18 = vmul.f32 %v688_v5, %v391_v7  ;;  %v239_v21 = vmul.f32 %v688_v5, %v398_v10  ;;  %v240_v23 = vmul.f32 %v688_v5, %v405_v13 }
  0x6c   :  { %v704_v26 = vrot.slane %v227_v8, %v231_v57  ;;  %v241_v0 = vmul.f32 %v688_v5, %v412_v16  ;;  %v242_v1 = vmul.f32 %v688_v5, %v419_v19  ;;  %v243_v2 = vmul.f32 %v688_v5, %v426_v22 }
  0x6d   :  { %v244_v3 = vmul.f32 %v688_v5, %v433_v25  ;;  %v245_v7 = vmul.f32 %v688_v5, %v438_v27  ;;  %v246_v10 = vmul.f32 %v688_v5, %v455_v35  ;;  %v247_v13 = vmul.f32 %v688_v5, %v467_v42 }
  0x6e   :  { %v272_v16 = vadd.f32 %v704_v26, %v234_v11  ;;  %v273_v28 = vadd.f32 %v704_v26, %v235_v12  ;;  %v274_v19 = vadd.f32 %v704_v26, %v236_v14  ;;  %v275_v22 = vadd.f32 %v704_v26, %v237_v17 }
  0x6f   :  { %v276_v29 = vadd.f32 %v704_v26, %v238_v18  ;;  %v277_v25 = vadd.f32 %v704_v26, %v239_v21  ;;  %v278_v27 = vadd.f32 %v704_v26, %v240_v23  ;;  %v279_v31 = vadd.f32 %v704_v26, %v241_v0 }
  0x70   :  { %304 = vst.msk [vmem:[%s919_s3] sm:$0xff] %vm46_vm0, %v272_v16  ;;  %305 = vst.msk [vmem:[%s919_s3 + $0x8] sm:$0xff] %vm46_vm0, %v273_v28  ;;  %v280_v35 = vadd.f32 %v704_v26, %v242_v1  ;;  %v281_v42 = vadd.f32 %v704_v26, %v243_v2  ;;  %v282_v33 = vadd.f32 %v704_v26, %v244_v3 }
  0x71   :  { %306 = vst.msk [vmem:[%s919_s3 + $0x10] sm:$0xff] %vm46_vm0, %v274_v19  ;;  %307 = vst.msk [vmem:[%s919_s3 + $0x18] sm:$0xff] %vm46_vm0, %v275_v22  ;;  %v283_v34 = vadd.f32 %v704_v26, %v245_v7  ;;  %v284_v36 = vadd.f32 %v704_v26, %v246_v10  ;;  %v285_v37 = vadd.f32 %v704_v26, %v247_v13 }
  0x72   :  { %308 = vst.msk [vmem:[%s919_s3 + $0x20] sm:$0xff] %vm46_vm0, %v276_v29  ;;  %309 = vst.msk [vmem:[%s919_s3 + $0x28] sm:$0xff] %vm46_vm0, %v277_v25  ;;  %v248_v40 = vmul.f32 %v688_v5, %v477_v48  ;;  %v249_v41 = vmul.f32 %v688_v5, %v487_v54  ;;  %v250_v48 = vmul.f32 %v688_v5, %v497_v60 }
  0x73   :  { %310 = vst.msk [vmem:[%s919_s3 + $0x30] sm:$0xff] %vm46_vm0, %v278_v27  ;;  %311 = vst.msk [vmem:[%s919_s3 + $0x38] sm:$0xff] %vm46_vm0, %v279_v31  ;;  %v251_v54 = vmul.f32 %v688_v5, %v507_v6  ;;  %v252_v43 = vmul.f32 %v688_v5, %v517_v15  ;;  %v253_v44 = vmul.f32 %v688_v5, %v527_v24 }
  0x74   :  { %312 = vst.msk [vmem:[%s919_s3 + $0x40] sm:$0xff] %vm46_vm0, %v280_v35  ;;  %313 = vst.msk [vmem:[%s919_s3 + $0x48] sm:$0xff] %vm46_vm0, %v281_v42  ;;  %v286_v60 = vadd.f32 %v704_v26, %v248_v40  ;;  %v287_v6 = vadd.f32 %v704_v26, %v249_v41  ;;  %v254_v15 = vmul.f32 %v688_v5, %v537_v32 }
  0x75   :  { %314 = vst.msk [vmem:[%s919_s3 + $0x50] sm:$0xff] %vm46_vm0, %v282_v33  ;;  %315 = vst.msk [vmem:[%s919_s3 + $0x58] sm:$0xff] %vm46_vm0, %v283_v34  ;;  %v255_v24 = vmul.f32 %v688_v5, %v547_v39  ;;  %v288_v45 = vadd.f32 %v704_v26, %v250_v48  ;;  %v289_v49 = vadd.f32 %v704_v26, %v251_v54 }
  0x76   :  { %316 = vst.msk [vmem:[%s919_s3 + $0x60] sm:$0xff] %vm46_vm0, %v284_v36  ;;  %317 = vst.msk [vmem:[%s919_s3 + $0x68] sm:$0xff] %vm46_vm0, %v285_v37  ;;  %v290_v50 = vadd.f32 %v704_v26, %v252_v43  ;;  %v291_v51 = vadd.f32 %v704_v26, %v253_v44  ;;  %v292_v32 = vadd.f32 %v704_v26, %v254_v15 }
  0x77   :  { %318 = vst.msk [vmem:[%s919_s3 + $0x70] sm:$0xff] %vm46_vm0, %v286_v60  ;;  %319 = vst.msk [vmem:[%s919_s3 + $0x78] sm:$0xff] %vm46_vm0, %v287_v6  ;;  %v293_v39 = vadd.f32 %v704_v26, %v255_v24  ;;  %v256_v52 = vmul.f32 %v688_v5, %v557_v46  ;;  %v257_v55 = vmul.f32 %v688_v5, %v567_v53 }
  0x78   :  { %320 = vst.msk [vmem:[%s919_s3 + $0x80] sm:$0xff] %vm46_vm0, %v288_v45  ;;  %321 = vst.msk [vmem:[%s919_s3 + $0x88] sm:$0xff] %vm46_vm0, %v289_v49  ;;  %v258_v46 = vmul.f32 %v688_v5, %v577_v61  ;;  %v259_v53 = vmul.f32 %v688_v5, %v587_v9  ;;  %v260_v57 = vmul.f32 %v688_v5, %v597_v20 }
  0x79   :  { %322 = vst.msk [vmem:[%s919_s3 + $0x90] sm:$0xff] %vm46_vm0, %v290_v50  ;;  %323 = vst.msk [vmem:[%s919_s3 + $0x98] sm:$0xff] %vm46_vm0, %v291_v51  ;;  %v261_v58 = vmul.f32 %v688_v5, %v607_v30  ;;  %v294_v61 = vadd.f32 %v704_v26, %v256_v52  ;;  %v295_v9 = vadd.f32 %v704_v26, %v257_v55 }
  0x7a   :  { %324 = vst.msk [vmem:[%s919_s3 + $0xa0] sm:$0xff] %vm46_vm0, %v292_v32  ;;  %325 = vst.msk [vmem:[%s919_s3 + $0xa8] sm:$0xff] %vm46_vm0, %v293_v39  ;;  %v262_v20 = vmul.f32 %v688_v5, %v617_v38  ;;  %v263_v30 = vmul.f32 %v688_v5, %v627_v47  ;;  %v296_v59 = vadd.f32 %v704_v26, %v258_v46 }
  0x7b   :  { %v297_v62 = vadd.f32 %v704_v26, %v259_v53  ;;  %v298_v63 = vadd.f32 %v704_v26, %v260_v57  ;;  %v299_v8 = vadd.f32 %v704_v26, %v261_v58  ;;  %326 = vst.msk [vmem:[%s919_s3 + $0xb0] sm:$0xff] %vm46_vm0, %v294_v61  ;;  %327 = vst.msk [vmem:[%s919_s3 + $0xb8] sm:$0xff] %vm46_vm0, %v295_v9 }
  0x7c   :  { %v300_v38 = vadd.f32 %v704_v26, %v262_v20  ;;  %v301_v47 = vadd.f32 %v704_v26, %v263_v30  ;;  %v264_v11 = vmul.f32 %v688_v5, %v637_v56  ;;  %v265_v12 = vmul.f32 %v688_v5, %v647_v4  ;;  %328 = vst.msk [vmem:[%s919_s3 + $0xc0] sm:$0xff] %vm46_vm0, %v296_v59 }
  0x7d   :  { %329 = vst.msk [vmem:[%s919_s3 + $0xc8] sm:$0xff] %vm46_vm0, %v297_v62  ;;  %330 = vst.msk [vmem:[%s919_s3 + $0xd0] sm:$0xff] %vm46_vm0, %v298_v63 }
  0x7e   :  { %331 = vst.msk [vmem:[%s919_s3 + $0xd8] sm:$0xff] %vm46_vm0, %v299_v8  ;;  %332 = vst.msk [vmem:[%s919_s3 + $0xe0] sm:$0xff] %vm46_vm0, %v300_v38  ;;  %v302_v56 = vadd.f32 %v704_v26, %v264_v11  ;;  %v303_v4 = vadd.f32 %v704_v26, %v265_v12 }
  0x7f   :  { %333 = vst.msk [vmem:[%s919_s3 + $0xe8] sm:$0xff] %vm46_vm0, %v301_v47 }
  0x80   :  { %334 = vst.msk [vmem:[%s919_s3 + $0xf0] sm:$0xff] %vm46_vm0, %v302_v56  ;;  %335 = vst.msk [vmem:[%s919_s3 + $0xf8] sm:$0xff] %vm46_vm0, %v303_v4 }

</bundles_post_ra>
